<compile_context>
chip_gen: v6e
topology: v6e:2x2x1
jax: 0.10.0
libtpu: 0.0.40
codegen_flags: <defaults>
</compile_context>

<pallas_src>
from functools import partial

import jax
import jax.numpy as jnp
from jax.experimental import pallas as pl
from jax.experimental.pallas import tpu as pltpu

LANES = 128
SUBLANES = 8
CHUNK_ROWS = 256            # rows per fori_loop iteration in the sum kernel
MAX_TILE_ROWS_NONE = 4096   # 2 MiB f32 per input block ('none' path)
MAX_TILE_ROWS_SUM = 8192    # 4 MiB f32 per input block (sum/mean path)
SPLIT_ROWS = 512            # split into >= 2 blocks above this (v7x dual-TC)
VMEM_LIMIT_CAP = 48 << 20   # <= 75% of v7x per-core VMEM (64 MiB)


def _round_up(x: int, m: int) -> int:
    return ((x + m - 1) // m) * m


# --------------------------------------------------------------------------- #
# Kernels
# --------------------------------------------------------------------------- #
def _pinball_none_kernel(pred_ref, tgt_ref, out_ref, *, q):
    diff = tgt_ref[...].astype(jnp.float32) - pred_ref[...].astype(jnp.float32)
    loss = jnp.maximum(q * diff, (q - 1.0) * diff)
    out_ref[...] = loss.astype(out_ref.dtype)


def _pinball_partial_sum_kernel(pred_ref, tgt_ref, out_ref, *,
                                q, rows, tile_rows, chunk_rows, needs_mask):
    """Per-block (8, 128) partial sum, computed chunk-by-chunk.

    Only chunk_rows x 128 f32 temporaries are live at a time, so the full
    (tile_rows, 128) f32 loss is never materialized in VMEM.
    """
    n_chunks = tile_rows // chunk_rows
    block_row0 = pl.program_id(0) * tile_rows
    row_iota = jax.lax.broadcasted_iota(jnp.int32, (chunk_rows, LANES), 0)

    def body(c, acc):
        r0 = pl.multiple_of(c * chunk_rows, chunk_rows)
        p = pred_ref[pl.ds(r0, chunk_rows), :].astype(jnp.float32)
        t = tgt_ref[pl.ds(r0, chunk_rows), :].astype(jnp.float32)
        diff = t - p
        loss = jnp.maximum(q * diff, (q - 1.0) * diff)
        if needs_mask:
            # Zero rows past the true slab extent (undefined data from the
            # padded final partial block).  `rows` is a static Python int.
            loss = jnp.where(block_row0 + r0 + row_iota < rows, loss, 0.0)
        # VALU-only fold of groups of 8 sublanes into one (8, 128) partial.
        return acc + loss.reshape(-1, SUBLANES, LANES).sum(axis=0)

    out_ref[...] = jax.lax.fori_loop(
        0, n_chunks, body, jnp.zeros((SUBLANES, LANES), jnp.float32))


# --------------------------------------------------------------------------- #
# Wrapper
# --------------------------------------------------------------------------- #
def quantile_regression_loss(prediction, target, q=0.5, reduction="mean"):
    if reduction not in ("mean", "sum", "none"):
        raise ValueError(f"Incorrect reduction: {reduction}")
    if prediction.shape != target.shape:
        raise ValueError(
            f"prediction and target shapes must match, got "
            f"{prediction.shape} vs {target.shape}"
        )

    orig_shape = prediction.shape
    out_dtype = jnp.promote_types(prediction.dtype, target.dtype)
    if not jnp.issubdtype(out_dtype, jnp.floating):
        # Loss is floating point even for integer inputs (matches torch,
        # where q * diff promotes to float).
        out_dtype = jnp.float32
    n = prediction.size
    q = float(q)

    if n == 0:
        if reduction == "none":
            return jnp.zeros(orig_shape, dtype=out_dtype)
        if reduction == "sum":
            return jnp.zeros((), dtype=out_dtype)
        return jnp.full((), jnp.nan, dtype=out_dtype)  # mean of empty -> NaN

    # ---- slab geometry & tiling ---------------------------------------------
    rows = pl.cdiv(n, LANES)          # lane-dense slab row count
    pad_lanes = rows * LANES - n      # non-zero only when n % 128 != 0

    max_tile = MAX_TILE_ROWS_NONE if reduction == "none" else MAX_TILE_ROWS_SUM
    grid_steps = pl.cdiv(rows, max_tile)
    if grid_steps == 1 and rows > SPLIT_ROWS:
        grid_steps = 2                # >= 2 blocks so v7x can use both TCs
    tile_raw = pl.cdiv(rows, grid_steps)
    if tile_raw <= CHUNK_ROWS:
        tile_rows = _round_up(tile_raw, SUBLANES)
        chunk_rows = tile_rows
    else:
        tile_rows = _round_up(tile_raw, CHUNK_ROWS)
        chunk_rows = CHUNK_ROWS
    grid_steps = pl.cdiv(rows, tile_rows)
    needs_mask = grid_steps * tile_rows != rows   # final block is partial

    def to_slab(x):
        flat = x.reshape(-1)
        if pad_lanes:   # only copy when n is not already a multiple of 128
            flat = jnp.pad(flat, (0, pad_lanes))
        return flat.reshape(rows, LANES)

    pred2d = to_slab(prediction)
    tgt2d = to_slab(target)

    in_spec = pl.BlockSpec((tile_rows, LANES), lambda i: (i, 0))
    in_itemsize = pred2d.dtype.itemsize + tgt2d.dtype.itemsize
    in_bytes = rows * LANES * in_itemsize

    # ---- VMEM budget: 2x double-buffered inputs + 2x output blocks + temps ---
    in_tile_bytes = tile_rows * LANES * in_itemsize
    if reduction == "none":
        out_tile_bytes = tile_rows * LANES * jnp.dtype(out_dtype).itemsize
        temp_bytes = 3 * tile_rows * LANES * 4          # f32 elementwise temps
    else:
        out_tile_bytes = SUBLANES * LANES * 4
        temp_bytes = 4 * chunk_rows * LANES * 4         # per-chunk temps only
    need = 2 * in_tile_bytes + 2 * out_tile_bytes + temp_bytes
    vmem_limit = min(max(need + need // 2 + (4 << 20), 16 << 20), VMEM_LIMIT_CAP)

    cparams = pltpu.CompilerParams(
        dimension_semantics=("parallel",),
        vmem_limit_bytes=vmem_limit,
    )

    if reduction == "none":
        out = pl.pallas_call(
            partial(_pinball_none_kernel, q=q),
            out_shape=jax.ShapeDtypeStruct((rows, LANES), out_dtype),
            grid=(grid_steps,),
            in_specs=[in_spec, in_spec],
            out_specs=pl.BlockSpec((tile_rows, LANES), lambda i: (i, 0)),
            compiler_params=cparams,
            cost_estimate=pl.CostEstimate(
                flops=4 * rows * LANES,
                transcendentals=0,
                bytes_accessed=in_bytes
                + rows * LANES * jnp.dtype(out_dtype).itemsize,
            ),
        )(pred2d, tgt2d)
        out = out.reshape(-1)
        if pad_lanes:
            out = out[:n]
        return out.reshape(orig_shape)

    # sum / mean: per-block (8, 128) partial sums, fully parallel over blocks
    partials = pl.pallas_call(
        partial(_pinball_partial_sum_kernel, q=q, rows=rows,
                tile_rows=tile_rows, chunk_rows=chunk_rows,
                needs_mask=needs_mask),
        out_shape=jax.ShapeDtypeStruct((grid_steps * SUBLANES, LANES),
                                       jnp.float32),
        grid=(grid_steps,),
        in_specs=[in_spec, in_spec],
        out_specs=pl.BlockSpec((SUBLANES, LANES), lambda i: (i, 0)),
        compiler_params=cparams,
        cost_estimate=pl.CostEstimate(
            flops=5 * rows * LANES,
            transcendentals=0,
            bytes_accessed=in_bytes + grid_steps * SUBLANES * LANES * 4,
        ),
    )(pred2d, tgt2d)

    total = jnp.sum(partials)  # tiny final reduction (grid*8*128 f32)
    if reduction == "sum":
        return total.astype(out_dtype)
    return (total / n).astype(out_dtype)


class QuantileRegressionLoss:
    """JAX/Pallas port of karbonn.modules.QuantileRegressionLoss (no params)."""

    def __init__(self, reduction: str = "mean", q: float = 0.5) -> None:
        if reduction not in ("mean", "sum", "none"):
            raise ValueError(f"Incorrect reduction: {reduction}")
        self.reduction = str(reduction)
        self._q = float(q)

    def __repr__(self) -> str:
        return f"QuantileRegressionLoss(reduction={self.reduction}, q={self._q})"

    def __call__(self, prediction, target):
        return quantile_regression_loss(
            prediction, target, q=self._q, reduction=self.reduction
        )


def _reference(prediction, target, q=0.5, reduction="mean"):
    diff = target.astype(jnp.float32) - prediction.astype(jnp.float32)
    loss = jnp.maximum(q * diff, (q - 1.0) * diff)
    if reduction == "mean":
        return jnp.mean(loss)
    if reduction == "sum":
        return jnp.sum(loss)
    return loss


if __name__ == "__main__":
    key = jax.random.PRNGKey(0)
    k1, k2, k3, k4, k5, k6, k7, k8 = jax.random.split(key, 8)

    # Module's example shape (2, 4): tiny, exercises the pad + masked path.
    pred_small = jax.random.normal(k1, (2, 4), dtype=jnp.float32)
    tgt_small = jax.random.normal(k2, (2, 4), dtype=jnp.float32)
    # Non-128-aligned element count: exercises the minimal-pad path.
    pred_mid = jax.random.normal(k3, (4, 16, 17), dtype=jnp.float32)
    tgt_mid = jax.random.normal(k4, (4, 16, 17), dtype=jnp.float32)
    # 128-aligned, single block, no pad / no mask.
    pred_alg = jax.random.normal(k5, (2, 4, 128), dtype=jnp.float32)
    tgt_alg = jax.random.normal(k6, (2, 4, 128), dtype=jnp.float32)
    # 128-aligned, rows > 512: no pad, 2-block grid with masked partial tail.
    pred_big = jax.random.normal(k7, (6, 512, 96), dtype=jnp.float32)
    tgt_big = jax.random.normal(k8, (6, 512, 96), dtype=jnp.float32)
    # bf16 inputs (kernel computes in f32, casts result back to bf16).
    pred_bf16 = pred_mid.astype(jnp.bfloat16)
    tgt_bf16 = tgt_mid.astype(jnp.bfloat16)

    ok = True
    cases_f32 = (
        (pred_small, tgt_small),
        (pred_mid, tgt_mid),
        (pred_alg, tgt_alg),
        (pred_big, tgt_big),
    )
    for q in (0.5, 0.1, 0.9):
        for reduction in ("mean", "sum", "none"):
            criterion = QuantileRegressionLoss(reduction=reduction, q=q)
            for pred, tgt in cases_f32:
                got = jax.block_until_ready(criterion(pred, tgt))
                want = _reference(pred, tgt, q=q, reduction=reduction)
                ok &= bool(jnp.allclose(got, want, rtol=1e-5, atol=1e-5))
            got = jax.block_until_ready(criterion(pred_bf16, tgt_bf16))
            want = _reference(pred_bf16, tgt_bf16, q=q, reduction=reduction)
            ok &= bool(
                jnp.allclose(
                    got.astype(jnp.float32), want.astype(jnp.float32),
                    rtol=5e-2, atol=5e-2,
                )
            )

    if ok:
        print("KERNEL_OK")
    else:
        print("KERNEL_MISMATCH")
</pallas_src>

<mosaic_0001>
module attributes {stable_mosaic.version = 11 : i64} {
  func.func @_pinball_partial_sum_kernel(%arg0: i32, %arg1: memref<8x128xf32, #tpu.memory_space<vmem>>, %arg2: memref<8x128xf32, #tpu.memory_space<vmem>>, %arg3: memref<8x128xf32, #tpu.memory_space<vmem>>) attributes {dimension_semantics = [#tpu.dimension_semantics<parallel>], iteration_bounds = array<i64: 1>, scalar_prefetch = 0 : i64, scratch_operands = 0 : i64, tpu.core_type = #tpu.core_type<tc>, window_params = [{transform_indices = @transform_0, window_bounds = array<i64: 8, 128>}, {transform_indices = @transform_1, window_bounds = array<i64: 8, 128>}, {transform_indices = @transform_2, window_bounds = array<i64: 8, 128>}]} {
    %c8_i32 = arith.constant 8 : i32
    %0 = arith.muli %arg0, %c8_i32 : i32
    %1 = tpu.iota {dimensions = array<i32: 0>} : vector<8x128xi32>
    %cst = arith.constant 0.000000e+00 : f32
    %2 = vector.broadcast %cst : f32 to vector<8x128xf32>
    %c0_i32 = arith.constant 0 : i32
    %c8_i32_0 = arith.constant 8 : i32
    %3 = arith.muli %c0_i32, %c8_i32_0 : i32
    %4 = tpu.assume_multiple %3, 8 : i32
    %5 = arith.index_cast %4 : i32 to index
    %c0 = arith.constant 0 : index
    %6 = vector.load %arg1[%5, %c0] : memref<8x128xf32, #tpu.memory_space<vmem>>, vector<8x128xf32>
    %7 = arith.index_cast %4 : i32 to index
    %c0_1 = arith.constant 0 : index
    %8 = vector.load %arg2[%7, %c0_1] : memref<8x128xf32, #tpu.memory_space<vmem>>, vector<8x128xf32>
    %9 = arith.subf %8, %6 : vector<8x128xf32>
    %cst_2 = arith.constant 5.000000e-01 : f32
    %10 = vector.broadcast %cst_2 : f32 to vector<8x128xf32>
    %11 = arith.mulf %10, %9 : vector<8x128xf32>
    %cst_3 = arith.constant -5.000000e-01 : f32
    %12 = vector.broadcast %cst_3 : f32 to vector<8x128xf32>
    %13 = arith.mulf %12, %9 : vector<8x128xf32>
    %14 = arith.maximumf %11, %13 : vector<8x128xf32>
    %15 = arith.addi %0, %4 : i32
    %16 = vector.broadcast %15 : i32 to vector<8x128xi32>
    %17 = arith.addi %16, %1 : vector<8x128xi32>
    %c1_i32 = arith.constant 1 : i32
    %18 = vector.broadcast %c1_i32 : i32 to vector<8x128xi32>
    %19 = arith.cmpi slt, %17, %18 : vector<8x128xi32>
    %cst_4 = arith.constant 0.000000e+00 : f32
    %20 = vector.broadcast %cst_4 : f32 to vector<8x128xf32>
    %21 = arith.select %19, %14, %20 : vector<8x128xi1>, vector<8x128xf32>
    %22 = vector.shape_cast %21 : vector<8x128xf32> to vector<1x8x128xf32>
    %cst_5 = arith.constant dense<0.000000e+00> : vector<8x128xf32>
    %23 = vector.multi_reduction <add>, %22, %cst_5 [0] : vector<1x8x128xf32> to vector<8x128xf32>
    %24 = arith.addf %2, %23 : vector<8x128xf32>
    %c1_i32_6 = arith.constant 1 : i32
    %c0_7 = arith.constant 0 : index
    %c0_8 = arith.constant 0 : index
    %25 = vector.load %arg3[%c0_7, %c0_8] : memref<8x128xf32, #tpu.memory_space<vmem>>, vector<8x128xf32>
    tpu.vector_store %arg3[%c0_7, %c0_8], %24 {strides = array<i32>} : memref<8x128xf32, #tpu.memory_space<vmem>>, vector<8x128xf32>,
    return
  }
  func.func @transform_0(%arg0: i32) -> (i32, i32) {
    %c0_i32 = arith.constant 0 : i32
    %c0_i32_0 = arith.constant 0 : i32
    return %arg0, %c0_i32 : i32, i32
  }
  func.func @transform_1(%arg0: i32) -> (i32, i32) {
    %c0_i32 = arith.constant 0 : i32
    %c0_i32_0 = arith.constant 0 : i32
    return %arg0, %c0_i32 : i32, i32
  }
  func.func @transform_2(%arg0: i32) -> (i32, i32) {
    %c0_i32 = arith.constant 0 : i32
    %c0_i32_0 = arith.constant 0 : i32
    return %arg0, %c0_i32 : i32, i32
  }
}

</mosaic_0001>

<bundles_post_ra>
// kernel: tpu_custom_call.1
= control target key start
LH: loop header
LB: loop body
LE: loop exit
PB: predicated region body
PF: predicated region fallthrough
CT: control target
= control target key end

     0   :  { %7 = vsyncpa [#allocation3], 0  ;;  %s134_s0 = inlined_call_operand.hbm [shape: f32[1,128], index: 0, kind: input, shape index: {}]   ;;  %s135_s1 = inlined_call_operand.vmem [shape: f32[1,128], index: 1, kind: input, shape index: {}]   ;;  %s136_s2 = inlined_call_operand.hbm [shape: f32[8,128], index: 2, kind: output, shape index: {}]  }
   0x1   :  { %8 = vsyncpa [#allocation4], 0 }
   0x2   :  { %13 = vsyncadd [#allocation3], 112  ;;  %s106_s9 = smov [#allocation2]  }
   0x3   :  { %s14_s10 = sshll.u32 %s106_s9, 4  ;;  %s15_s10 = int_to_ptr.vmem [resolvable:$true] %s14_s10 }
   0x4   :  { %s70_s11 = scalar_lea.vmem %s15_s10, 16  ;;  %s74_s12 = scalar_lea.vmem %s15_s10, 128 }
   0x5   :  { %p71_p0 = scmp.ne.s32.totalorder %s15_s10, %s70_s11  ;;  %p75_p1 = scmp.lt.s32.totalorder %s15_s10, %s15_s10 }
   0x6   :  { %p76_p2 = scmp.lt.s32.totalorder %s74_s12, %s70_s11 }
   0x8   :  { %p77_p3 = por %p76_p2, %p75_p1 }
   0xa   :  { %p78_p4 = pnand %p77_p3, %p71_p0 }
   0xc   :  { %81 = shalt.err (!%p78_p4)
}
   0xd   :  { %s107_s13 = smov 16   ;;  %s108_s14 = smov 1  }
   0xe   :  { %20 = dma.hbm_to_vmem [thread:$0]  %s134_s0, 16, %s15_s10, [#allocation3], %s107_s13, %s107_s13, %s108_s14  }
   0xf   :  { %102 = dma.done.wait [#allocation3], 128  }
  0x10   :  { %103 = vsyncadd [#allocation3], 4294967168  ;;  %v27_v0 = vlaneseq  ;;  %v29_v2 = vld [vmem:[#allocation2] sm:$0xff]  ;;  %s109_s19 = smov [#allocation5]  }
  0x11   :  { %v30_v3 = vld [vmem:[%s135_s1] sm:$0xff]  ;;  %s49_s20 = sshll.u32 %s109_s19, 4  ;;  %s50_s20 = int_to_ptr.vmem [resolvable:$true] %s49_s20 }
  0x12   :  { %v28_v1 = vshrl.u32 %v27_v0, 7  ;;  %v31_v4 = vsub.f32 %v30_v3, %v29_v2  ;;  %s82_s0 = scalar_lea.vmem %s50_s20, 128  ;;  %p87_p6 = scmp.lt.s32.totalorder %s50_s20, %s50_s20 }
  0x13   :  { %p83_p5 = scmp.ne.s32.totalorder %s50_s20, %s82_s0  ;;  %p88_p7 = scmp.lt.s32.totalorder %s82_s0, %s82_s0 }
  0x14   :  { %v32_v5 = vmul.f32 0.5, %v31_v4  ;;  %v33_v6 = vmul.f32 -0.5, %v31_v4  ;;  %vm38_vm0 = vcmp.lt.s32.totalorder %v28_v1, 1 }
  0x15   :  { %p89_p8 = por %p88_p7, %p87_p6 }
  0x16   :  { %v34_v7 = vmax.f32 %v32_v5, %v33_v6 }
  0x17   :  { %p90_p9 = pnand %p89_p8, %p83_p5 }
  0x18   :  { %v39_v8 = vsel %vm38_vm0, %v34_v7, 0.0 }
  0x19   :  { %42 = vst [vmem:[#allocation5] sm:$0xff] %v39_v8 }
  0x1a   :  { %93 = shalt.err (!%p90_p9)
}
  0x1b   :  { %52 = dma.vmem_to_hbm [thread:$0]  %s50_s20, 128, %s136_s2, [#allocation4]  }
  0x1c   :  { %104 = dma.done.wait [#allocation4], 128  }
  0x1d   :  { %105 = vsyncadd [#allocation4], 4294967168 }
  0x1e   :  { %56 = vsyncpa [#allocation3], 1 }
  0x1f   :  { %57 = vsyncpa [#allocation4], 1 }

</bundles_post_ra>
